<compile_context>
chip_gen: v6e
topology: v6e:2x2x1
jax: 0.10.0
libtpu: 0.0.40
codegen_flags: <defaults>
</compile_context>

<pallas_src>
import math
import functools

import jax
import jax.numpy as jnp
from jax import lax
from jax.experimental import pallas as pl
from jax.experimental.pallas import tpu as pltpu


# ----------------------------------------------------------------------------
# Fused encoder kernel. Grid = (batch, layer); layer axis is the carried axis.
# ----------------------------------------------------------------------------

def _encoder_kernel(x_ref, causal_ref, pad_ref, pe_ref,
                    lin_w_ref, lin_b_ref,
                    wqkv_ref, bqkv_ref, wo_ref, bo_ref,
                    w1_ref, b1_ref, w2_ref, b2_ref,
                    ln1_g_ref, ln1_b_ref, ln2_g_ref, ln2_b_ref,
                    o_ref, h_ref, *, n_head, d_model):
    E = d_model
    H = n_head
    Dh = E // H
    S = pe_ref.shape[0]
    att_scale = 1.0 / math.sqrt(Dh)
    eps = 1e-5                                     # PyTorch LayerNorm default
    l = pl.program_id(1)

    # ---- layer 0 only: input projection -> *sqrt(E) -> +PE (init carry) ----
    @pl.when(l == 0)
    def _():
        emb = jnp.dot(x_ref[...].astype(jnp.bfloat16), lin_w_ref[...],
                      preferred_element_type=jnp.float32) + lin_b_ref[...]
        h_ref[...] = emb * math.sqrt(E) + pe_ref[...]

    h = h_ref[...]                                 # (S, E) f32 carry
    mask = causal_ref[...] + pad_ref[...]          # (S, S) additive, finite

    def layer_norm(y, g, b):
        mu = jnp.mean(y, axis=-1, keepdims=True)
        d = y - mu
        var = jnp.mean(d * d, axis=-1, keepdims=True)
        return d * lax.rsqrt(var + eps) * g + b

    # ---- self-attention: fused (E,3E) QKV matmul, heads batched ----
    qkv = jnp.dot(h.astype(jnp.bfloat16), wqkv_ref[...],
                  preferred_element_type=jnp.float32) + bqkv_ref[...]   # (S,3E)
    q = qkv[:, 0 * E:1 * E] * att_scale            # fold 1/sqrt(Dh) into q
    k = qkv[:, 1 * E:2 * E]
    v = qkv[:, 2 * E:3 * E]

    def to_heads(z):                               # (S, E) -> (H, S, Dh)
        return jnp.stack([z[:, hh * Dh:(hh + 1) * Dh] for hh in range(H)],
                         axis=0).astype(jnp.bfloat16)

    qh, kh, vh = to_heads(q), to_heads(k), to_heads(v)

    s = jnp.einsum('hqd,hkd->hqk', qh, kh,
                   preferred_element_type=jnp.float32)                  # (H,S,S)
    s = s + mask[None, :, :]
    m = jnp.max(s, axis=-1, keepdims=True)
    p = jnp.exp(s - m)
    p = p * pl.reciprocal(jnp.sum(p, axis=-1, keepdims=True), approx=True)
    ctx = jnp.einsum('hqk,hkd->hqd', p.astype(jnp.bfloat16), vh,
                     preferred_element_type=jnp.float32)                # (H,S,Dh)
    ctx = jnp.concatenate([ctx[hh] for hh in range(H)], axis=-1)        # (S, E)

    attn = jnp.dot(ctx.astype(jnp.bfloat16), wo_ref[...],
                   preferred_element_type=jnp.float32) + bo_ref[...]

    # ---- residual + LayerNorm 1 (post-norm) ----
    h = layer_norm(h + attn, ln1_g_ref[...], ln1_b_ref[...])

    # ---- feed-forward (ReLU) + residual + LayerNorm 2 ----
    ff = jnp.dot(h.astype(jnp.bfloat16), w1_ref[...],
                 preferred_element_type=jnp.float32) + b1_ref[...]
    ff = jnp.maximum(ff, 0.0)
    ff = jnp.dot(ff.astype(jnp.bfloat16), w2_ref[...],
                 preferred_element_type=jnp.float32) + b2_ref[...]
    h = layer_norm(h + ff, ln2_g_ref[...], ln2_b_ref[...])

    h_ref[...] = h                                 # carry to next layer
    o_ref[...] = h                                 # final l's value is kept


# ----------------------------------------------------------------------------
# Wrapper: mask prep, BlockSpecs, single pallas_call over grid (B, L).
# ----------------------------------------------------------------------------

def encoder_forward(params, input_seq, attn_mask, src_key_padding_mask,
                    *, n_head, d_model):
    """input_seq: (S, B, input_size); attn_mask: (S, S) additive float
    (0 / -inf, PyTorch convention); src_key_padding_mask: (B, S) bool
    (True = padded). Returns (S, B, d_model), matching nn.TransformerEncoder
    with batch_first=False (dropout = identity / eval mode)."""
    S, B, Fin = input_seq.shape
    E = d_model
    L = params["wqkv"].shape[0]

    # Shared (S,S) user/causal mask (clamped so fully-masked rows stay finite)
    # and a per-batch (B,1,S) key-padding bias; combined in-kernel -> no
    # (B,S,S) HBM materialization.
    causal = jnp.maximum(attn_mask.astype(jnp.float32), jnp.float32(-1e9))
    pad_bias = jnp.where(src_key_padding_mask[:, None, :],
                         jnp.float32(-1e9), jnp.float32(0.0))

    # Small layout transposes kept host-side (batch-in-middle squeezed blocks
    # would break the (8,128) last-two-dims rule).
    x_b = jnp.transpose(input_seq, (1, 0, 2)).astype(jnp.float32)   # (B, S, Fin)
    pe_s = params["pe"][:S, 0, :]                                   # (S, E)

    def shared(shape):
        return pl.BlockSpec(shape, lambda b, l, n=len(shape): (0,) * n)

    def per_layer(shape):
        return pl.BlockSpec((None,) + shape, lambda b, l: (l, 0, 0))

    def per_batch(shape):
        return pl.BlockSpec((None,) + shape, lambda b, l: (b, 0, 0))

    kernel = functools.partial(_encoder_kernel, n_head=n_head, d_model=E)

    out_b = pl.pallas_call(
        kernel,
        grid=(B, L),
        in_specs=[
            per_batch((S, Fin)),                     # x (per batch element)
            shared((S, S)),                          # user attention mask
            per_batch((1, S)),                       # key-padding bias
            shared((S, E)),                          # positional encoding
            shared((Fin, E)), shared((1, E)),        # lin_transform
            per_layer((E, 3 * E)), per_layer((1, 3 * E)),   # fused QKV
            per_layer((E, E)), per_layer((1, E)),           # attn out-proj
            per_layer((E, 4 * E)), per_layer((1, 4 * E)),   # FF linear1
            per_layer((4 * E, E)), per_layer((1, E)),       # FF linear2
            per_layer((1, E)), per_layer((1, E)),           # LayerNorm1
            per_layer((1, E)), per_layer((1, E)),           # LayerNorm2
        ],
        out_specs=pl.BlockSpec((None, S, E), lambda b, l: (b, 0, 0)),
        out_shape=jax.ShapeDtypeStruct((B, S, E), jnp.float32),
        scratch_shapes=[pltpu.VMEM((S, E), jnp.float32)],    # hidden-state carry
        compiler_params=pltpu.CompilerParams(
            dimension_semantics=("parallel", "arbitrary"),   # B across TCs
            vmem_limit_bytes=32 * 1024 * 1024),
    )(x_b, causal, pad_bias, pe_s,
      params["lin_w"], params["lin_b"],
      params["wqkv"], params["bqkv"],
      params["wo"], params["bo"],
      params["w1"], params["b1"],
      params["w2"], params["b2"],
      params["ln1_g"], params["ln1_b"],
      params["ln2_g"], params["ln2_b"])

    return jnp.transpose(out_b, (1, 0, 2))                   # (S, B, E)


# ----------------------------------------------------------------------------
# Deterministic synthetic parameters. Matmul weights are stored (in, out) and
# in bf16 (MXU fast path); biases / LayerNorm / PE stay f32.
# (When loading real PyTorch weights, transpose the (out, in) tensors.)
# ----------------------------------------------------------------------------

def init_params(key, input_size, d_model, n_head, n_layers, max_len):
    E = d_model
    ks = iter(jax.random.split(key, 64))

    def w(shape, s=0.05):
        return (s * jax.random.normal(next(ks), shape)).astype(jnp.bfloat16)

    def zeros(shape):
        return jnp.zeros(shape, jnp.float32)

    # sinusoidal positional-encoding table (max_len, 1, E)
    pos = jnp.arange(max_len, dtype=jnp.float32)[:, None]
    div = jnp.exp(jnp.arange(0, E, 2, dtype=jnp.float32)
                  * (-math.log(10000.0) / E))
    pe = jnp.zeros((max_len, E), jnp.float32)
    pe = pe.at[:, 0::2].set(jnp.sin(pos * div))
    pe = pe.at[:, 1::2].set(jnp.cos(pos * div))

    # TODO(synk): PositionalEncoding.scale is an nn.Parameter that the
    # reference forward never uses; dropout is identity (eval) — both omitted.
    return dict(
        lin_w=w((input_size, E)), lin_b=zeros((1, E)),
        pe=pe[:, None, :],
        wqkv=w((n_layers, E, 3 * E)), bqkv=zeros((n_layers, 1, 3 * E)),
        wo=w((n_layers, E, E)), bo=zeros((n_layers, 1, E)),
        w1=w((n_layers, E, 4 * E)), b1=zeros((n_layers, 1, 4 * E)),
        w2=w((n_layers, 4 * E, E)), b2=zeros((n_layers, 1, E)),
        ln1_g=jnp.ones((n_layers, 1, E), jnp.float32),
        ln1_b=zeros((n_layers, 1, E)),
        ln2_g=jnp.ones((n_layers, 1, E), jnp.float32),
        ln2_b=zeros((n_layers, 1, E)),
    )


# ----------------------------------------------------------------------------

if __name__ == "__main__":
    S, B = 8, 2
    input_size = 16
    d_model = 32
    n_head = 4
    n_layers_encoder = 2
    max_len = 64

    key = jax.random.PRNGKey(0)
    k_in, k_par = jax.random.split(key)
    input_seq = jax.random.normal(k_in, (S, B, input_size), dtype=jnp.float32)
    params = init_params(k_par, input_size, d_model, n_head,
                         n_layers_encoder, max_len)

    # Causal (square subsequent) mask, PyTorch convention: 0 allowed, -inf masked.
    idx = jnp.arange(S)
    attn_mask = jnp.where(idx[None, :] <= idx[:, None],
                          0.0, -jnp.inf).astype(jnp.float32)
    # Key-padding mask (B, S): pad the last two timesteps of batch element 1.
    src_key_padding_mask = jnp.zeros((B, S), jnp.bool_).at[1, S - 2:].set(True)

    out = encoder_forward(params, input_seq, attn_mask, src_key_padding_mask,
                          n_head=n_head, d_model=d_model)
    out = jax.block_until_ready(out)
    assert out.shape == (S, B, d_model), out.shape
    assert bool(jnp.all(jnp.isfinite(out)))
    print("KERNEL_OK")
</pallas_src>

<mosaic_0001>
module attributes {stable_mosaic.version = 11 : i64} {
  func.func @_encoder_kernel(%arg0: i32, %arg1: i32, %arg2: memref<1x8x16xf32, #tpu.memory_space<vmem>>, %arg3: memref<8x8xf32, #tpu.memory_space<vmem>>, %arg4: memref<1x1x8xf32, #tpu.memory_space<vmem>>, %arg5: memref<8x32xf32, #tpu.memory_space<vmem>>, %arg6: memref<16x32xbf16, #tpu.memory_space<vmem>>, %arg7: memref<1x32xf32, #tpu.memory_space<vmem>>, %arg8: memref<1x32x96xbf16, #tpu.memory_space<vmem>>, %arg9: memref<1x1x96xf32, #tpu.memory_space<vmem>>, %arg10: memref<1x32x32xbf16, #tpu.memory_space<vmem>>, %arg11: memref<1x1x32xf32, #tpu.memory_space<vmem>>, %arg12: memref<1x32x128xbf16, #tpu.memory_space<vmem>>, %arg13: memref<1x1x128xf32, #tpu.memory_space<vmem>>, %arg14: memref<1x128x32xbf16, #tpu.memory_space<vmem>>, %arg15: memref<1x1x32xf32, #tpu.memory_space<vmem>>, %arg16: memref<1x1x32xf32, #tpu.memory_space<vmem>>, %arg17: memref<1x1x32xf32, #tpu.memory_space<vmem>>, %arg18: memref<1x1x32xf32, #tpu.memory_space<vmem>>, %arg19: memref<1x1x32xf32, #tpu.memory_space<vmem>>, %arg20: memref<1x8x32xf32, #tpu.memory_space<vmem>>, %arg21: memref<8x32xf32, #tpu.memory_space<vmem>>) attributes {dimension_semantics = [#tpu.dimension_semantics<parallel>, #tpu.dimension_semantics<arbitrary>], iteration_bounds = array<i64: 2, 2>, scalar_prefetch = 0 : i64, scratch_operands = 1 : i64, tpu.core_type = #tpu.core_type<tc>, window_params = [{transform_indices = @transform_0, window_bounds = array<i64: 1, 8, 16>}, {pipeline_mode = #tpu.pipeline_mode<synchronous>, transform_indices = @transform_1, window_bounds = array<i64: 8, 8>}, {transform_indices = @transform_2, window_bounds = array<i64: 1, 1, 8>}, {pipeline_mode = #tpu.pipeline_mode<synchronous>, transform_indices = @transform_3, window_bounds = array<i64: 8, 32>}, {pipeline_mode = #tpu.pipeline_mode<synchronous>, transform_indices = @transform_4, window_bounds = array<i64: 16, 32>}, {pipeline_mode = #tpu.pipeline_mode<synchronous>, transform_indices = @transform_5, window_bounds = array<i64: 1, 32>}, {transform_indices = @transform_6, window_bounds = array<i64: 1, 32, 96>}, {transform_indices = @transform_7, window_bounds = array<i64: 1, 1, 96>}, {transform_indices = @transform_8, window_bounds = array<i64: 1, 32, 32>}, {transform_indices = @transform_9, window_bounds = array<i64: 1, 1, 32>}, {transform_indices = @transform_10, window_bounds = array<i64: 1, 32, 128>}, {transform_indices = @transform_11, window_bounds = array<i64: 1, 1, 128>}, {transform_indices = @transform_12, window_bounds = array<i64: 1, 128, 32>}, {transform_indices = @transform_13, window_bounds = array<i64: 1, 1, 32>}, {transform_indices = @transform_14, window_bounds = array<i64: 1, 1, 32>}, {transform_indices = @transform_15, window_bounds = array<i64: 1, 1, 32>}, {transform_indices = @transform_16, window_bounds = array<i64: 1, 1, 32>}, {transform_indices = @transform_17, window_bounds = array<i64: 1, 1, 32>}, {transform_indices = @transform_18, window_bounds = array<i64: 1, 8, 32>}]} {
    %c0_i32 = arith.constant 0 : i32
    %0 = arith.cmpi eq, %arg1, %c0_i32 : i32
    %1 = arith.extui %0 : i1 to i32
    %c0_i32_0 = arith.constant 0 : i32
    %2 = arith.cmpi ne, %1, %c0_i32_0 : i32
    scf.if %2 {
      %c0_67 = arith.constant 0 : index
      %c0_68 = arith.constant 0 : index
      %c0_69 = arith.constant 0 : index
      %157 = vector.load %arg2[%c0_67, %c0_68, %c0_69] : memref<1x8x16xf32, #tpu.memory_space<vmem>>, vector<1x8x16xf32>
      %158 = vector.shape_cast %157 : vector<1x8x16xf32> to vector<8x16xf32>
      %159 = arith.truncf %158 : vector<8x16xf32> to vector<8x16xbf16>
      %c0_70 = arith.constant 0 : index
      %c0_71 = arith.constant 0 : index
      %160 = vector.load %arg6[%c0_70, %c0_71] : memref<16x32xbf16, #tpu.memory_space<vmem>>, vector<16x32xbf16>
      %cst_72 = arith.constant dense<0.000000e+00> : vector<8x32xf32>
      %161 = tpu.matmul %159, %160, %cst_72 {dimension_numbers = #tpu.dot_dimension_numbers<[1], [0], [0], [1], [0, 0, 1, 1], [], []>} : vector<8x16xbf16>, vector<16x32xbf16>, vector<8x32xf32> -> vector<8x32xf32>
      %c0_73 = arith.constant 0 : index
      %c0_74 = arith.constant 0 : index
      %162 = vector.load %arg7[%c0_73, %c0_74] : memref<1x32xf32, #tpu.memory_space<vmem>>, vector<1x32xf32>
      %163 = vector.broadcast %162 : vector<1x32xf32> to vector<8x32xf32>
      %164 = arith.addf %161, %163 : vector<8x32xf32>
      %cst_75 = arith.constant 5.65685415 : f32
      %165 = vector.broadcast %cst_75 : f32 to vector<8x32xf32>
      %166 = arith.mulf %164, %165 : vector<8x32xf32>
      %c0_76 = arith.constant 0 : index
      %c0_77 = arith.constant 0 : index
      %167 = vector.load %arg5[%c0_76, %c0_77] : memref<8x32xf32, #tpu.memory_space<vmem>>, vector<8x32xf32>
      %168 = arith.addf %166, %167 : vector<8x32xf32>
      %c0_78 = arith.constant 0 : index
      %c0_79 = arith.constant 0 : index
      %169 = vector.load %arg21[%c0_78, %c0_79] : memref<8x32xf32, #tpu.memory_space<vmem>>, vector<8x32xf32>
      tpu.vector_store %arg21[%c0_78, %c0_79], %168 {strides = array<i32>} : memref<8x32xf32, #tpu.memory_space<vmem>>, vector<8x32xf32>,
    } else {
    }
    %c0 = arith.constant 0 : index
    %c0_1 = arith.constant 0 : index
    %3 = vector.load %arg21[%c0, %c0_1] : memref<8x32xf32, #tpu.memory_space<vmem>>, vector<8x32xf32>
    %c0_2 = arith.constant 0 : index
    %c0_3 = arith.constant 0 : index
    %4 = vector.load %arg3[%c0_2, %c0_3] : memref<8x8xf32, #tpu.memory_space<vmem>>, vector<8x8xf32>
    %c0_4 = arith.constant 0 : index
    %c0_5 = arith.constant 0 : index
    %c0_6 = arith.constant 0 : index
    %5 = vector.load %arg4[%c0_4, %c0_5, %c0_6] : memref<1x1x8xf32, #tpu.memory_space<vmem>>, vector<1x1x8xf32>
    %6 = vector.shape_cast %5 : vector<1x1x8xf32> to vector<1x8xf32>
    %7 = vector.broadcast %6 : vector<1x8xf32> to vector<8x8xf32>
    %8 = arith.addf %4, %7 : vector<8x8xf32>
    %9 = arith.truncf %3 : vector<8x32xf32> to vector<8x32xbf16>
    %c0_7 = arith.constant 0 : index
    %c0_8 = arith.constant 0 : index
    %c0_9 = arith.constant 0 : index
    %10 = vector.load %arg8[%c0_7, %c0_8, %c0_9] : memref<1x32x96xbf16, #tpu.memory_space<vmem>>, vector<1x32x96xbf16>
    %11 = vector.shape_cast %10 : vector<1x32x96xbf16> to vector<32x96xbf16>
    %cst = arith.constant dense<0.000000e+00> : vector<8x96xf32>
    %12 = tpu.matmul %9, %11, %cst {dimension_numbers = #tpu.dot_dimension_numbers<[1], [0], [0], [1], [0, 0, 1, 1], [], []>} : vector<8x32xbf16>, vector<32x96xbf16>, vector<8x96xf32> -> vector<8x96xf32>
    %c0_10 = arith.constant 0 : index
    %c0_11 = arith.constant 0 : index
    %c0_12 = arith.constant 0 : index
    %13 = vector.load %arg9[%c0_10, %c0_11, %c0_12] : memref<1x1x96xf32, #tpu.memory_space<vmem>>, vector<1x1x96xf32>
    %14 = vector.shape_cast %13 : vector<1x1x96xf32> to vector<1x96xf32>
    %15 = vector.broadcast %14 : vector<1x96xf32> to vector<8x96xf32>
    %16 = arith.addf %12, %15 : vector<8x96xf32>
    %17 = vector.extract_strided_slice %16 {offsets = [0, 0], sizes = [8, 32], strides = [1, 1]} : vector<8x96xf32> to vector<8x32xf32>
    %cst_13 = arith.constant 0.353553385 : f32
    %18 = vector.broadcast %cst_13 : f32 to vector<8x32xf32>
    %19 = arith.mulf %17, %18 : vector<8x32xf32>
    %20 = vector.extract_strided_slice %16 {offsets = [0, 32], sizes = [8, 32], strides = [1, 1]} : vector<8x96xf32> to vector<8x32xf32>
    %21 = vector.extract_strided_slice %16 {offsets = [0, 64], sizes = [8, 32], strides = [1, 1]} : vector<8x96xf32> to vector<8x32xf32>
    %22 = vector.extract_strided_slice %19 {offsets = [0, 0], sizes = [8, 8], strides = [1, 1]} : vector<8x32xf32> to vector<8x8xf32>
    %23 = vector.extract_strided_slice %19 {offsets = [0, 8], sizes = [8, 8], strides = [1, 1]} : vector<8x32xf32> to vector<8x8xf32>
    %24 = vector.extract_strided_slice %19 {offsets = [0, 16], sizes = [8, 8], strides = [1, 1]} : vector<8x32xf32> to vector<8x8xf32>
    %25 = vector.extract_strided_slice %19 {offsets = [0, 24], sizes = [8, 8], strides = [1, 1]} : vector<8x32xf32> to vector<8x8xf32>
    %26 = vector.shape_cast %22 : vector<8x8xf32> to vector<1x8x8xf32>
    %27 = vector.shape_cast %23 : vector<8x8xf32> to vector<1x8x8xf32>
    %28 = vector.shape_cast %24 : vector<8x8xf32> to vector<1x8x8xf32>
    %29 = vector.shape_cast %25 : vector<8x8xf32> to vector<1x8x8xf32>
    %30 = tpu.concatenate %26, %27, %28, %29 in 0 : vector<1x8x8xf32>, vector<1x8x8xf32>, vector<1x8x8xf32>, vector<1x8x8xf32> -> vector<4x8x8xf32>
    %31 = arith.truncf %30 : vector<4x8x8xf32> to vector<4x8x8xbf16>
    %32 = vector.extract_strided_slice %20 {offsets = [0, 0], sizes = [8, 8], strides = [1, 1]} : vector<8x32xf32> to vector<8x8xf32>
    %33 = vector.extract_strided_slice %20 {offsets = [0, 8], sizes = [8, 8], strides = [1, 1]} : vector<8x32xf32> to vector<8x8xf32>
    %34 = vector.extract_strided_slice %20 {offsets = [0, 16], sizes = [8, 8], strides = [1, 1]} : vector<8x32xf32> to vector<8x8xf32>
    %35 = vector.extract_strided_slice %20 {offsets = [0, 24], sizes = [8, 8], strides = [1, 1]} : vector<8x32xf32> to vector<8x8xf32>
    %36 = vector.shape_cast %32 : vector<8x8xf32> to vector<1x8x8xf32>
    %37 = vector.shape_cast %33 : vector<8x8xf32> to vector<1x8x8xf32>
    %38 = vector.shape_cast %34 : vector<8x8xf32> to vector<1x8x8xf32>
    %39 = vector.shape_cast %35 : vector<8x8xf32> to vector<1x8x8xf32>
    %40 = tpu.concatenate %36, %37, %38, %39 in 0 : vector<1x8x8xf32>, vector<1x8x8xf32>, vector<1x8x8xf32>, vector<1x8x8xf32> -> vector<4x8x8xf32>
    %41 = arith.truncf %40 : vector<4x8x8xf32> to vector<4x8x8xbf16>
    %42 = vector.extract_strided_slice %21 {offsets = [0, 0], sizes = [8, 8], strides = [1, 1]} : vector<8x32xf32> to vector<8x8xf32>
    %43 = vector.extract_strided_slice %21 {offsets = [0, 8], sizes = [8, 8], strides = [1, 1]} : vector<8x32xf32> to vector<8x8xf32>
    %44 = vector.extract_strided_slice %21 {offsets = [0, 16], sizes = [8, 8], strides = [1, 1]} : vector<8x32xf32> to vector<8x8xf32>
    %45 = vector.extract_strided_slice %21 {offsets = [0, 24], sizes = [8, 8], strides = [1, 1]} : vector<8x32xf32> to vector<8x8xf32>
    %46 = vector.shape_cast %42 : vector<8x8xf32> to vector<1x8x8xf32>
    %47 = vector.shape_cast %43 : vector<8x8xf32> to vector<1x8x8xf32>
    %48 = vector.shape_cast %44 : vector<8x8xf32> to vector<1x8x8xf32>
    %49 = vector.shape_cast %45 : vector<8x8xf32> to vector<1x8x8xf32>
    %50 = tpu.concatenate %46, %47, %48, %49 in 0 : vector<1x8x8xf32>, vector<1x8x8xf32>, vector<1x8x8xf32>, vector<1x8x8xf32> -> vector<4x8x8xf32>
    %51 = arith.truncf %50 : vector<4x8x8xf32> to vector<4x8x8xbf16>
    "tpu.trace_start"() <{level = 10 : i32, message = "hqd,hkd->hqk"}> : () -> ()
    %cst_14 = arith.constant dense<0.000000e+00> : vector<4x8x8xf32>
    %52 = tpu.matmul %31, %41, %cst_14 {dimension_numbers = #tpu.dot_dimension_numbers<[2], [2], [1], [1], [0, 0, 0, 1, 1, 1], [0], [0]>} : vector<4x8x8xbf16>, vector<4x8x8xbf16>, vector<4x8x8xf32> -> vector<4x8x8xf32>
    "tpu.trace_stop"() : () -> ()
    %53 = vector.shape_cast %8 : vector<8x8xf32> to vector<1x8x8xf32>
    %54 = vector.broadcast %53 : vector<1x8x8xf32> to vector<4x8x8xf32>
    %55 = arith.addf %52, %54 : vector<4x8x8xf32>
    %cst_15 = arith.constant dense<0xFF800000> : vector<4x8xf32>
    %56 = vector.multi_reduction <maximumf>, %55, %cst_15 [2] : vector<4x8x8xf32> to vector<4x8xf32>
    %57 = vector.shape_cast %56 : vector<4x8xf32> to vector<4x8x1xf32>
    %58 = vector.broadcast %57 : vector<4x8x1xf32> to vector<4x8x8xf32>
    %59 = arith.subf %55, %58 : vector<4x8x8xf32>
    %60 = math.exp %59 : vector<4x8x8xf32>
    %cst_16 = arith.constant dense<0.000000e+00> : vector<4x8xf32>
    %61 = vector.multi_reduction <add>, %60, %cst_16 [2] : vector<4x8x8xf32> to vector<4x8xf32>
    %62 = vector.shape_cast %61 : vector<4x8xf32> to vector<4x8x1xf32>
    %63 = tpu.reciprocal %62 {approx = true} : vector<4x8x1xf32> -> vector<4x8x1xf32>
    %64 = vector.broadcast %63 : vector<4x8x1xf32> to vector<4x8x8xf32>
    %65 = arith.mulf %60, %64 : vector<4x8x8xf32>
    %66 = arith.truncf %65 : vector<4x8x8xf32> to vector<4x8x8xbf16>
    "tpu.trace_start"() <{level = 10 : i32, message = "hqk,hkd->hqd"}> : () -> ()
    %cst_17 = arith.constant dense<0.000000e+00> : vector<4x8x8xf32>
    %67 = tpu.matmul %66, %51, %cst_17 {dimension_numbers = #tpu.dot_dimension_numbers<[2], [1], [1], [2], [0, 0, 0, 1, 1, 2], [0], [0]>} : vector<4x8x8xbf16>, vector<4x8x8xbf16>, vector<4x8x8xf32> -> vector<4x8x8xf32>
    "tpu.trace_stop"() : () -> ()
    %68 = vector.extract_strided_slice %67 {offsets = [0, 0, 0], sizes = [1, 8, 8], strides = [1, 1, 1]} : vector<4x8x8xf32> to vector<1x8x8xf32>
    %69 = vector.shape_cast %68 : vector<1x8x8xf32> to vector<8x8xf32>
    %70 = vector.extract_strided_slice %67 {offsets = [1, 0, 0], sizes = [1, 8, 8], strides = [1, 1, 1]} : vector<4x8x8xf32> to vector<1x8x8xf32>
    %71 = vector.shape_cast %70 : vector<1x8x8xf32> to vector<8x8xf32>
    %72 = vector.extract_strided_slice %67 {offsets = [2, 0, 0], sizes = [1, 8, 8], strides = [1, 1, 1]} : vector<4x8x8xf32> to vector<1x8x8xf32>
    %73 = vector.shape_cast %72 : vector<1x8x8xf32> to vector<8x8xf32>
    %74 = vector.extract_strided_slice %67 {offsets = [3, 0, 0], sizes = [1, 8, 8], strides = [1, 1, 1]} : vector<4x8x8xf32> to vector<1x8x8xf32>
    %75 = vector.shape_cast %74 : vector<1x8x8xf32> to vector<8x8xf32>
    %76 = tpu.concatenate %69, %71, %73, %75 in 1 : vector<8x8xf32>, vector<8x8xf32>, vector<8x8xf32>, vector<8x8xf32> -> vector<8x32xf32>
    %77 = arith.truncf %76 : vector<8x32xf32> to vector<8x32xbf16>
    %c0_18 = arith.constant 0 : index
    %c0_19 = arith.constant 0 : index
    %c0_20 = arith.constant 0 : index
    %78 = vector.load %arg10[%c0_18, %c0_19, %c0_20] : memref<1x32x32xbf16, #tpu.memory_space<vmem>>, vector<1x32x32xbf16>
    %79 = vector.shape_cast %78 : vector<1x32x32xbf16> to vector<32x32xbf16>
    %cst_21 = arith.constant dense<0.000000e+00> : vector<8x32xf32>
    %80 = tpu.matmul %77, %79, %cst_21 {dimension_numbers = #tpu.dot_dimension_numbers<[1], [0], [0], [1], [0, 0, 1, 1], [], []>} : vector<8x32xbf16>, vector<32x32xbf16>, vector<8x32xf32> -> vector<8x32xf32>
    %c0_22 = arith.constant 0 : index
    %c0_23 = arith.constant 0 : index
    %c0_24 = arith.constant 0 : index
    %81 = vector.load %arg11[%c0_22, %c0_23, %c0_24] : memref<1x1x32xf32, #tpu.memory_space<vmem>>, vector<1x1x32xf32>
    %82 = vector.shape_cast %81 : vector<1x1x32xf32> to vector<1x32xf32>
    %83 = vector.broadcast %82 : vector<1x32xf32> to vector<8x32xf32>
    %84 = arith.addf %80, %83 : vector<8x32xf32>
    %85 = arith.addf %3, %84 : vector<8x32xf32>
    %c0_25 = arith.constant 0 : index
    %c0_26 = arith.constant 0 : index
    %c0_27 = arith.constant 0 : index
    %86 = vector.load %arg16[%c0_25, %c0_26, %c0_27] : memref<1x1x32xf32, #tpu.memory_space<vmem>>, vector<1x1x32xf32>
    %87 = vector.shape_cast %86 : vector<1x1x32xf32> to vector<1x32xf32>
    %c0_28 = arith.constant 0 : index
    %c0_29 = arith.constant 0 : index
    %c0_30 = arith.constant 0 : index
    %88 = vector.load %arg17[%c0_28, %c0_29, %c0_30] : memref<1x1x32xf32, #tpu.memory_space<vmem>>, vector<1x1x32xf32>
    %89 = vector.shape_cast %88 : vector<1x1x32xf32> to vector<1x32xf32>
    %cst_31 = arith.constant dense<0.000000e+00> : vector<8xf32>
    %90 = vector.multi_reduction <add>, %85, %cst_31 [1] : vector<8x32xf32> to vector<8xf32>
    %91 = vector.shape_cast %90 : vector<8xf32> to vector<8x1xf32>
    %cst_32 = arith.constant 3.200000e+01 : f32
    %92 = vector.broadcast %cst_32 : f32 to vector<8x1xf32>
    %93 = arith.divf %91, %92 : vector<8x1xf32>
    %94 = vector.broadcast %93 : vector<8x1xf32> to vector<8x32xf32>
    %95 = arith.subf %85, %94 : vector<8x32xf32>
    %96 = arith.mulf %95, %95 : vector<8x32xf32>
    %cst_33 = arith.constant dense<0.000000e+00> : vector<8xf32>
    %97 = vector.multi_reduction <add>, %96, %cst_33 [1] : vector<8x32xf32> to vector<8xf32>
    %98 = vector.shape_cast %97 : vector<8xf32> to vector<8x1xf32>
    %cst_34 = arith.constant 3.200000e+01 : f32
    %99 = vector.broadcast %cst_34 : f32 to vector<8x1xf32>
    %100 = arith.divf %98, %99 : vector<8x1xf32>
    %cst_35 = arith.constant 9.99999974E-6 : f32
    %101 = vector.broadcast %cst_35 : f32 to vector<8x1xf32>
    %102 = arith.addf %100, %101 : vector<8x1xf32>
    %103 = math.rsqrt %102 : vector<8x1xf32>
    %104 = vector.broadcast %103 : vector<8x1xf32> to vector<8x32xf32>
    %105 = arith.mulf %95, %104 : vector<8x32xf32>
    %106 = vector.broadcast %87 : vector<1x32xf32> to vector<8x32xf32>
    %107 = arith.mulf %105, %106 : vector<8x32xf32>
    %108 = vector.broadcast %89 : vector<1x32xf32> to vector<8x32xf32>
    %109 = arith.addf %107, %108 : vector<8x32xf32>
    %110 = arith.truncf %109 : vector<8x32xf32> to vector<8x32xbf16>
    %c0_36 = arith.constant 0 : index
    %c0_37 = arith.constant 0 : index
    %c0_38 = arith.constant 0 : index
    %111 = vector.load %arg12[%c0_36, %c0_37, %c0_38] : memref<1x32x128xbf16, #tpu.memory_space<vmem>>, vector<1x32x128xbf16>
    %112 = vector.shape_cast %111 : vector<1x32x128xbf16> to vector<32x128xbf16>
    %cst_39 = arith.constant dense<0.000000e+00> : vector<8x128xf32>
    %113 = tpu.matmul %110, %112, %cst_39 {dimension_numbers = #tpu.dot_dimension_numbers<[1], [0], [0], [1], [0, 0, 1, 1], [], []>} : vector<8x32xbf16>, vector<32x128xbf16>, vector<8x128xf32> -> vector<8x128xf32>
    %c0_40 = arith.constant 0 : index
    %c0_41 = arith.constant 0 : index
    %c0_42 = arith.constant 0 : index
    %114 = vector.load %arg13[%c0_40, %c0_41, %c0_42] : memref<1x1x128xf32, #tpu.memory_space<vmem>>, vector<1x1x128xf32>
    %115 = vector.shape_cast %114 : vector<1x1x128xf32> to vector<1x128xf32>
    %116 = vector.broadcast %115 : vector<1x128xf32> to vector<8x128xf32>
    %117 = arith.addf %113, %116 : vector<8x128xf32>
    %cst_43 = arith.constant 0.000000e+00 : f32
    %118 = vector.broadcast %cst_43 : f32 to vector<8x128xf32>
    %119 = arith.maximumf %117, %118 : vector<8x128xf32>
    %120 = arith.truncf %119 : vector<8x128xf32> to vector<8x128xbf16>
    %c0_44 = arith.constant 0 : index
    %c0_45 = arith.constant 0 : index
    %c0_46 = arith.constant 0 : index
    %121 = vector.load %arg14[%c0_44, %c0_45, %c0_46] : memref<1x128x32xbf16, #tpu.memory_space<vmem>>, vector<1x128x32xbf16>
    %122 = vector.shape_cast %121 : vector<1x128x32xbf16> to vector<128x32xbf16>
    %cst_47 = arith.constant dense<0.000000e+00> : vector<8x32xf32>
    %123 = tpu.matmul %120, %122, %cst_47 {dimension_numbers = #tpu.dot_dimension_numbers<[1], [0], [0], [1], [0, 0, 1, 1], [], []>} : vector<8x128xbf16>, vector<128x32xbf16>, vector<8x32xf32> -> vector<8x32xf32>
    %c0_48 = arith.constant 0 : index
    %c0_49 = arith.constant 0 : index
    %c0_50 = arith.constant 0 : index
    %124 = vector.load %arg15[%c0_48, %c0_49, %c0_50] : memref<1x1x32xf32, #tpu.memory_space<vmem>>, vector<1x1x32xf32>
    %125 = vector.shape_cast %124 : vector<1x1x32xf32> to vector<1x32xf32>
    %126 = vector.broadcast %125 : vector<1x32xf32> to vector<8x32xf32>
    %127 = arith.addf %123, %126 : vector<8x32xf32>
    %128 = arith.addf %109, %127 : vector<8x32xf32>
    %c0_51 = arith.constant 0 : index
    %c0_52 = arith.constant 0 : index
    %c0_53 = arith.constant 0 : index
    %129 = vector.load %arg18[%c0_51, %c0_52, %c0_53] : memref<1x1x32xf32, #tpu.memory_space<vmem>>, vector<1x1x32xf32>
    %130 = vector.shape_cast %129 : vector<1x1x32xf32> to vector<1x32xf32>
    %c0_54 = arith.constant 0 : index
    %c0_55 = arith.constant 0 : index
    %c0_56 = arith.constant 0 : index
    %131 = vector.load %arg19[%c0_54, %c0_55, %c0_56] : memref<1x1x32xf32, #tpu.memory_space<vmem>>, vector<1x1x32xf32>
    %132 = vector.shape_cast %131 : vector<1x1x32xf32> to vector<1x32xf32>
    %cst_57 = arith.constant dense<0.000000e+00> : vector<8xf32>
    %133 = vector.multi_reduction <add>, %128, %cst_57 [1] : vector<8x32xf32> to vector<8xf32>
    %134 = vector.shape_cast %133 : vector<8xf32> to vector<8x1xf32>
    %cst_58 = arith.constant 3.200000e+01 : f32
    %135 = vector.broadcast %cst_58 : f32 to vector<8x1xf32>
    %136 = arith.divf %134, %135 : vector<8x1xf32>
    %137 = vector.broadcast %136 : vector<8x1xf32> to vector<8x32xf32>
    %138 = arith.subf %128, %137 : vector<8x32xf32>
    %139 = arith.mulf %138, %138 : vector<8x32xf32>
    %cst_59 = arith.constant dense<0.000000e+00> : vector<8xf32>
    %140 = vector.multi_reduction <add>, %139, %cst_59 [1] : vector<8x32xf32> to vector<8xf32>
    %141 = vector.shape_cast %140 : vector<8xf32> to vector<8x1xf32>
    %cst_60 = arith.constant 3.200000e+01 : f32
    %142 = vector.broadcast %cst_60 : f32 to vector<8x1xf32>
    %143 = arith.divf %141, %142 : vector<8x1xf32>
    %cst_61 = arith.constant 9.99999974E-6 : f32
    %144 = vector.broadcast %cst_61 : f32 to vector<8x1xf32>
    %145 = arith.addf %143, %144 : vector<8x1xf32>
    %146 = math.rsqrt %145 : vector<8x1xf32>
    %147 = vector.broadcast %146 : vector<8x1xf32> to vector<8x32xf32>
    %148 = arith.mulf %138, %147 : vector<8x32xf32>
    %149 = vector.broadcast %130 : vector<1x32xf32> to vector<8x32xf32>
    %150 = arith.mulf %148, %149 : vector<8x32xf32>
    %151 = vector.broadcast %132 : vector<1x32xf32> to vector<8x32xf32>
    %152 = arith.addf %150, %151 : vector<8x32xf32>
    %c0_62 = arith.constant 0 : index
    %c0_63 = arith.constant 0 : index
    %153 = vector.load %arg21[%c0_62, %c0_63] : memref<8x32xf32, #tpu.memory_space<vmem>>, vector<8x32xf32>
    tpu.vector_store %arg21[%c0_62, %c0_63], %152 {strides = array<i32>} : memref<8x32xf32, #tpu.memory_space<vmem>>, vector<8x32xf32>,
    %c0_64 = arith.constant 0 : index
    %c0_65 = arith.constant 0 : index
    %c0_66 = arith.constant 0 : index
    %154 = vector.load %arg20[%c0_64, %c0_65, %c0_66] : memref<1x8x32xf32, #tpu.memory_space<vmem>>, vector<1x8x32xf32>
    %155 = vector.shape_cast %154 : vector<1x8x32xf32> to vector<8x32xf32>
    %156 = vector.shape_cast %152 : vector<8x32xf32> to vector<1x8x32xf32>
    tpu.vector_store %arg20[%c0_64, %c0_65, %c0_66], %156 {strides = array<i32>} : memref<1x8x32xf32, #tpu.memory_space<vmem>>, vector<1x8x32xf32>,
    return
  }
  func.func @transform_0(%arg0: i32, %arg1: i32) -> (i32, i32, i32) {
    %c0_i32 = arith.constant 0 : i32
    %c0_i32_0 = arith.constant 0 : i32
    %c0_i32_1 = arith.constant 0 : i32
    return %arg0, %c0_i32, %c0_i32_0 : i32, i32, i32
  }
  func.func @transform_1(%arg0: i32, %arg1: i32) -> (i32, i32) {
    %c0_i32 = arith.constant 0 : i32
    %c0_i32_0 = arith.constant 0 : i32
    %c0_i32_1 = arith.constant 0 : i32
    return %c0_i32, %c0_i32_0 : i32, i32
  }
  func.func @transform_2(%arg0: i32, %arg1: i32) -> (i32, i32, i32) {
    %c0_i32 = arith.constant 0 : i32
    %c0_i32_0 = arith.constant 0 : i32
    %c0_i32_1 = arith.constant 0 : i32
    return %arg0, %c0_i32, %c0_i32_0 : i32, i32, i32
  }
  func.func @transform_3(%arg0: i32, %arg1: i32) -> (i32, i32) {
    %c0_i32 = arith.constant 0 : i32
    %c0_i32_0 = arith.constant 0 : i32
    %c0_i32_1 = arith.constant 0 : i32
    return %c0_i32, %c0_i32_0 : i32, i32
  }
  func.func @transform_4(%arg0: i32, %arg1: i32) -> (i32, i32) {
    %c0_i32 = arith.constant 0 : i32
    %c0_i32_0 = arith.constant 0 : i32
    %c0_i32_1 = arith.constant 0 : i32
    return %c0_i32, %c0_i32_0 : i32, i32
  }
  func.func @transform_5(%arg0: i32, %arg1: i32) -> (i32, i32) {
    %c0_i32 = arith.constant 0 : i32
    %c0_i32_0 = arith.constant 0 : i32
    %c0_i32_1 = arith.constant 0 : i32
    return %c0_i32, %c0_i32_0 : i32, i32
  }
  func.func @transform_6(%arg0: i32, %arg1: i32) -> (i32, i32, i32) {
    %c0_i32 = arith.constant 0 : i32
    %c0_i32_0 = arith.constant 0 : i32
    %c0_i32_1 = arith.constant 0 : i32
    return %arg1, %c0_i32, %c0_i32_0 : i32, i32, i32
  }
  func.func @transform_7(%arg0: i32, %arg1: i32) -> (i32, i32, i32) {
    %c0_i32 = arith.constant 0 : i32
    %c0_i32_0 = arith.constant 0 : i32
    %c0_i32_1 = arith.constant 0 : i32
    return %arg1, %c0_i32, %c0_i32_0 : i32, i32, i32
  }
  func.func @transform_8(%arg0: i32, %arg1: i32) -> (i32, i32, i32) {
    %c0_i32 = arith.constant 0 : i32
    %c0_i32_0 = arith.constant 0 : i32
    %c0_i32_1 = arith.constant 0 : i32
    return %arg1, %c0_i32, %c0_i32_0 : i32, i32, i32
  }
  func.func @transform_9(%arg0: i32, %arg1: i32) -> (i32, i32, i32) {
    %c0_i32 = arith.constant 0 : i32
    %c0_i32_0 = arith.constant 0 : i32
    %c0_i32_1 = arith.constant 0 : i32
    return %arg1, %c0_i32, %c0_i32_0 : i32, i32, i32
  }
  func.func @transform_10(%arg0: i32, %arg1: i32) -> (i32, i32, i32) {
    %c0_i32 = arith.constant 0 : i32
    %c0_i32_0 = arith.constant 0 : i32
    %c0_i32_1 = arith.constant 0 : i32
    return %arg1, %c0_i32, %c0_i32_0 : i32, i32, i32
  }
  func.func @transform_11(%arg0: i32, %arg1: i32) -> (i32, i32, i32) {
    %c0_i32 = arith.constant 0 : i32
    %c0_i32_0 = arith.constant 0 : i32
    %c0_i32_1 = arith.constant 0 : i32
    return %arg1, %c0_i32, %c0_i32_0 : i32, i32, i32
  }
  func.func @transform_12(%arg0: i32, %arg1: i32) -> (i32, i32, i32) {
    %c0_i32 = arith.constant 0 : i32
    %c0_i32_0 = arith.constant 0 : i32
    %c0_i32_1 = arith.constant 0 : i32
    return %arg1, %c0_i32, %c0_i32_0 : i32, i32, i32
  }
  func.func @transform_13(%arg0: i32, %arg1: i32) -> (i32, i32, i32) {
    %c0_i32 = arith.constant 0 : i32
    %c0_i32_0 = arith.constant 0 : i32
    %c0_i32_1 = arith.constant 0 : i32
    return %arg1, %c0_i32, %c0_i32_0 : i32, i32, i32
  }
  func.func @transform_14(%arg0: i32, %arg1: i32) -> (i32, i32, i32) {
    %c0_i32 = arith.constant 0 : i32
    %c0_i32_0 = arith.constant 0 : i32
    %c0_i32_1 = arith.constant 0 : i32
    return %arg1, %c0_i32, %c0_i32_0 : i32, i32, i32
  }
  func.func @transform_15(%arg0: i32, %arg1: i32) -> (i32, i32, i32) {
    %c0_i32 = arith.constant 0 : i32
    %c0_i32_0 = arith.constant 0 : i32
    %c0_i32_1 = arith.constant 0 : i32
    return %arg1, %c0_i32, %c0_i32_0 : i32, i32, i32
  }
  func.func @transform_16(%arg0: i32, %arg1: i32) -> (i32, i32, i32) {
    %c0_i32 = arith.constant 0 : i32
    %c0_i32_0 = arith.constant 0 : i32
    %c0_i32_1 = arith.constant 0 : i32
    return %arg1, %c0_i32, %c0_i32_0 : i32, i32, i32
  }
  func.func @transform_17(%arg0: i32, %arg1: i32) -> (i32, i32, i32) {
    %c0_i32 = arith.constant 0 : i32
    %c0_i32_0 = arith.constant 0 : i32
    %c0_i32_1 = arith.constant 0 : i32
    return %arg1, %c0_i32, %c0_i32_0 : i32, i32, i32
  }
  func.func @transform_18(%arg0: i32, %arg1: i32) -> (i32, i32, i32) {
    %c0_i32 = arith.constant 0 : i32
    %c0_i32_0 = arith.constant 0 : i32
    %c0_i32_1 = arith.constant 0 : i32
    return %arg0, %c0_i32, %c0_i32_0 : i32, i32, i32
  }
}

</mosaic_0001>

<bundles_post_ra>
// kernel: tpu_custom_call.1
= control target key start
LH: loop header
LB: loop body
LE: loop exit
PB: predicated region body
PF: predicated region fallthrough
CT: control target
= control target key end

     0   :  { %s2838_s0 = inlined_call_operand.vmem [shape: f32[2,8,16], index: 0, kind: input, shape index: {}]   ;;  %s2839_s1 = inlined_call_operand.vmem [shape: f32[8,8], index: 1, kind: input, shape index: {}]   ;;  %s2840_s2 = inlined_call_operand.vmem [shape: f32[2,1,8], index: 2, kind: input, shape index: {}]   ;;  %s2841_s3 = inlined_call_operand.vmem [shape: f32[8,32], index: 3, kind: input, shape index: {}]   ;;  %s2842_s4 = inlined_call_operand.vmem [shape: bf16[16,32], index: 4, kind: input, shape index: {}]   ;;  %s2843_s5 = inlined_call_operand.vmem [shape: f32[1,32], index: 5, kind: input, shape index: {}]   ;;  %s2844_s6 = inlined_call_operand.vmem [shape: bf16[2,32,96], index: 6, kind: input, shape index: {}]   ;;  %s2845_s7 = inlined_call_operand.vmem [shape: f32[2,1,96], index: 7, kind: input, shape index: {}]   ;;  %s2846_s8 = inlined_call_operand.vmem [shape: bf16[2,32,32], index: 8, kind: input, shape index: {}]   ;;  %s2847_s9 = inlined_call_operand.vmem [shape: f32[2,1,32], index: 9, kind: input, shape index: {}]   ;;  %s2848_s10 = inlined_call_operand.vmem [shape: bf16[2,32,128], index: 10, kind: input, shape index: {}]   ;;  %s2849_s11 = inlined_call_operand.vmem [shape: f32[2,1,128], index: 11, kind: input, shape index: {}]   ;;  %s2850_s12 = inlined_call_operand.vmem [shape: bf16[2,128,32], index: 12, kind: input, shape index: {}]   ;;  %s2851_s13 = inlined_call_operand.vmem [shape: f32[2,1,32], index: 13, kind: input, shape index: {}]   ;;  %s2852_s14 = inlined_call_operand.vmem [shape: f32[2,1,32], index: 14, kind: input, shape index: {}]   ;;  %s2853_s15 = inlined_call_operand.vmem [shape: f32[2,1,32], index: 15, kind: input, shape index: {}]   ;;  %s2854_s16 = inlined_call_operand.vmem [shape: f32[2,1,32], index: 16, kind: input, shape index: {}]   ;;  %s2855_s17 = inlined_call_operand.vmem [shape: f32[2,1,32], index: 17, kind: input, shape index: {}]   ;;  %s2856_s18 = inlined_call_operand.hbm [shape: f32[2,8,32], index: 18, kind: output, shape index: {}]  }
   0x1   :  { %2872 = sst [smem:[#allocation19_spill]] %s2838_s0 }
   0x2   :  { %2873 = sst [smem:[#allocation20_spill]] %s2839_s1 }
   0x3   :  { %2874 = sst [smem:[#allocation21_spill]] %s2840_s2 }
   0x4   :  { %2875 = sst [smem:[#allocation22_spill]] %s2841_s3 }
   0x5   :  { %2876 = sst [smem:[#allocation23_spill]] %s2842_s4 }
   0x6   :  { %2877 = sst [smem:[#allocation24_spill]] %s2843_s5 }
   0x7   :  { %2878 = sst [smem:[#allocation25_spill]] %s2844_s6 }
   0x8   :  { %2879 = sst [smem:[#allocation26_spill]] %s2846_s8 }
   0x9   :  { %2880 = sst [smem:[#allocation27_spill]] %s2848_s10 }
   0xa   :  { %2881 = sst [smem:[#allocation28_spill]] %s2849_s11 }
   0xb   :  { %2882 = sst [smem:[#allocation29_spill]] %s2851_s13 }
   0xc   :  { %2883 = sst [smem:[#allocation30_spill]] %s2854_s16 }
   0xd   :  { %2884 = sst [smem:[#allocation31_spill]] %s2855_s17 }
   0xe   :  { %2885 = sst [smem:[#allocation32_spill]] %s2856_s18 }
   0xf   :  { %23 = vsyncpa [#allocation4], 0 }
  0x10   :  { %25 = vsyncpa [#allocation4 + $0x1], 0  ;;  %s2460_s27 = smov 0   ;;  %s2462_s28 = smov 0  }
  0x11   :  { %s2464_s29 = smov 0   ;;  %s2466_s30 = smov 0  }
  0x12   :  { %s2468_s0 = smov 0   ;;  %s2470_s19 = smov 0  }
  0x13   :  { %s2472_s1 = smov 0   ;;  %s2474_s20 = smov 0  }
  0x14 LB: > { %2886 = sst [smem:[#allocation6_spill]] %s2322_s27  ;;  %s1945_s21 = sadd.s32 4294967295, %s2350_s20   ;;  %s2350_s20 = sphi %s2474_s20, %s31_s20   ;;  %s2346_s1 = sphi %s2472_s1, %s2939_s1   ;;  %s2342_s19 = sphi %s2470_s19, %s2938_s19   ;;  %s2338_s0 = sphi %s2468_s0, %s2937_s0   ;;  %s2334_s30 = sphi %s2466_s30, %s2936_s30   ;;  %s2330_s29 = sphi %s2464_s29, %s2935_s29   ;;  %s2326_s28 = sphi %s2462_s28, %s2934_s28   ;;  %s2322_s27 = sphi %s2460_s27, %s2933_s27  }
  0x15   : > { %2887 = sst [smem:[#allocation7_spill]] %s2326_s28  ;;  %s1946_s22 = sadd.s32 4294967294, %s2350_s20  }
  0x16   : > { %2888 = sst [smem:[#allocation8_spill]] %s2330_s29  ;;  %s40_s2 = sadd.s32 1, %s2342_s19 }
  0x17   : > { %2889 = sst [smem:[#allocation9_spill]] %s2334_s30  ;;  %p41_p0 = scmp.ge.s32.totalorder %s40_s2, 2 }
  0x18   : > { %2890 = sst [smem:[#allocation10_spill]] %s2338_s0  ;;  %s43_s23 = sadd.s32 1, %s2346_s1 }
  0x19   : > { %2891 = sst [smem:[#allocation11_spill]] %s2342_s19  ;;  %p508_p1 = scmp.ne.s32.totalorder %s2330_s29, %s2326_s28 }
  0x1a   : > { %2892 = sst [smem:[#allocation12_spill]] %s2346_s1  ;;  %p509_p2 = scmp.eq.s32.totalorder %s1945_s21, 3 }
  0x1b   : > { %2893 = sst [smem:[#allocation13_spill]] %s2350_s20  ;;  %s2941_s2 = smov (%p41_p0, %s40_s2), 0 }
  0x1c   : > { %2894 = sst [smem:[#allocation14_spill]] %s2941_s2  ;;  %s2943_s23 = smov (!%p41_p0, %s43_s23), %s2346_s1 }
  0x1d   : > { %p2509_p3 = por %p509_p2, %p508_p1  ;;  %p514_p4 = scmp.ne.s32.totalorder %s2326_s28, %s2322_s27 }
  0x1e   : > { %p45_p5 = scmp.ge.s32.totalorder %s2943_s23, 2  ;;  %p515_p6 = scmp.eq.s32.totalorder %s1946_s22, 3 }
  0x1f   : > { %s2895_s24 = scalar_select %p2509_p3, 1, 0 }
  0x20   : > { %p1949_p7 = scmp.ge.s32.totalorder %s2350_s20, 1  ;;  %p638_p8 = scmp.lt.s32.totalorder %s2350_s20, 5 }
  0x21   : > { %2896 = sst [smem:[#allocation15_spill]] %s2895_s24  ;;  %s2945_s23 = smov (%p45_p5, %s2943_s23), 0 }
  0x22   : > { %2897 = sst [smem:[#allocation16_spill]] %s2945_s23  ;;  %p2519_p9 = por %p515_p6, %p514_p4 }
  0x23   : > { %p639_p10 = pnand %p1949_p7, %p638_p8  ;;  %s495_s26 = ssub.s32 %s2346_s1, %s2945_s23 }
  0x24   : > { %s2898_s25 = scalar_select %p2519_p9, 1, 0 }
  0x25   : > { %s498_s21 = sadd.s32 1, %s2330_s29  ;;  %p496_p11 = scmp.eq.s32.totalorder %s495_s26, 0 }
  0x26   : > { %2899 = sst [smem:[#allocation17_spill]] %s2898_s25  ;;  %642 = sbr.rel (%p639_p10) target bundleno = 2765 (0xacd), region = 92 }
  0x27   : > { %s2527_s2 = scalar_select %p496_p11, %s2330_s29, %s498_s21  }
  0x28   : > { %s2860_s22 = sand.u32 (!%p639_p10), 1, %s2326_s28   ;;  %p738_p12 = scmp.lt.s32.totalorder (!%p639_p10), %s2338_s0, 1 }
  0x29   : > { %2900 = sst [smem:[#allocation18_spill]] %s2527_s2  ;;  %s2533_s19 = sshll.u32 (!%p639_p10), %s2860_s22, 3 }
  0x2a   : > { %p745_p13 = scmp.lt.s32.totalorder (!%p639_p10), %s2334_s30, 1  ;;  %s2902_s20 = sld [smem:[#allocation19_spill]] (!%p639_p10) }
  0x2b   : > { %s2537_s25 = scalar_select %p738_p12, %s2338_s0, 1 }
  0x2c   : > { %s2540_s26 = scalar_select %p745_p13, %s2334_s30, 1 }
  0x2d   : > { %s1951_s21 = sshll.u32 %s2537_s25, 3  ;;  %s2903_s6 = sld [smem:[#allocation25_spill]] }
  0x2e   : > { %s2002_s24 = sshll.u32 %s2540_s26, 4  ;;  %s2904_s8 = sld [smem:[#allocation26_spill]] }
  0x2f   : > { %s2905_s10 = sld [smem:[#allocation27_spill]]  ;;  %s2005_s4 = sshll.u32 %s2540_s26, 6 }
  0x30   : > { %s741_s18 = scalar_lea.vmem %s2902_s20, %s1951_s21  ;;  %s779_s29 = scalar_lea.vmem %s2852_s14, %s2540_s26 }
  0x31   : > { %s782_s27 = scalar_lea.vmem %s2853_s15, %s2540_s26  ;;  %s2908_s2 = sld [smem:[#allocation30_spill]] }
  0x32   : > { %s2909_s5 = sld [smem:[#allocation31_spill]]  ;;  %s737_s13 = scalar_lea.vmem [#allocation3], %s2533_s19 }
  0x33   : > { %s2554_s3 = scalar_lea.vmem %s2903_s6, %s2002_s24  ;;  %s2910_s6 = sld [smem:[#allocation9_spill]] }
  0x34   : > { %s2563_s23 = scalar_lea.vmem %s2904_s8, %s2002_s24  ;;  %s2586_s8 = scalar_lea.vmem %s2850_s12, %s2005_s4 }
  0x35   : > { %s2572_s21 = scalar_lea.vmem %s2905_s10, %s2002_s24 }
  0x37   : > { %s785_s10 = scalar_lea.vmem %s2908_s2, %s2540_s26 }
  0x38   : > { %s788_s16 = scalar_lea.vmem %s2909_s5, %s2540_s26 }
  0x39   : > { %p1960_p0 = scmp.ne.s32.totalorder %s2910_s6, 0 }
  0x3a   : > { %s2911_s1 = sld [smem:[#allocation23_spill]] (!%p1960_p0) }
  0x3b   : > { %793 = sbr.rel (%p1960_p0) target bundleno = 269 (0x10d), region = 96  ;;  %s2912_s22 = sld [smem:[#allocation24_spill]] (!%p1960_p0) }
  0x3c   : > { %s2913_s28 = sld [smem:[#allocation22_spill]] (!%p1960_p0) }
  0x40   : > { %v2223_v0 = vld [vmem:[%s2911_s1] sm:$0xff]   ;;  %v2352_v1 = vmov 0.0   ;;  %vm2353_vm0 = vmmov 0   ;;  %vm811_vm1 = vcmask 130048   ;;  %vm858_vm2 = vcmask 261120  }
  0x41   : > { %2042 = vmatprep.subr.bf16.mxu0 %v2352_v1  ;;  %v794_v2 = vld [vmem:[%s741_s18] sm:$0xff]  ;;  %2044 = vmatprep.mubr.msk.bf16.mxu0 %vm2353_vm0, %v2352_v1 }
  0x42   : > { %2043 = vmatpush3.bf16.msra.mxu0 %v2223_v0  ;;  %v795_v3 = vpack.c.bf16 %v794_v2, %v794_v2  ;;  %v1961_v4 = vld [vmem:[%s2912_s22] ss:$0 sm:$0xff] }
  0x43   : > { %v856_v7 = vld [vmem:[%s2913_s28] sm:$0xff] }
  0x45   : > { %2045 = vmatmul.mubr.msk.bf16.vlgmr.msra.gmra.mxu0 %vm811_vm1, %v795_v3 }
 0x105   : > { %v849_v5 = vpop.f32.mrf.mxu0 }
 0x106   : > { %v850_v6 = vadd.f32 %v1961_v4, %v849_v5 }
 0x107   : > { %v2046_v8 = vpop.f32.mrf.mxu0 }
 0x108   : > { %v855_v9 = vmul.f32 5.656854, %v850_v6 }
 0x109   : > { %v852_v10 = vpop.f32.mrf.mxu0 }
 0x10a   : > { %v857_v11 = vadd.f32 %v856_v7, %v855_v9 }
 0x10b   : > { %v2047_v12 = vpop.f32.mrf.mxu0 }
 0x10c   : > { %859 = vst.msk [vmem:[#allocation2] sm:$0xff] %vm858_vm2, %v857_v11 }
 0x10d PF: > { %v2224_v13 = vld [vmem:[%s2554_s3 + $0x8] sm:$0xff]   ;;  %v2354_v14 = vmov 0.0   ;;  %v2225_v15 = vld [vmem:[%s2554_s3] sm:$0xff]   ;;  %vm2355_vm3 = vmmov 0   ;;  %vm894_vm4 = vcmask 261120   ;;  %s2914_s0 = scalar_lea.vmem %s2845_s7, %s2540_s26  ;;  %s2356_s30 = smov 104  }
 0x10e   : > { %2048 = vmatprep.subr.bf16.mxu0 %v2354_v14  ;;  %2068 = vmatprep.subr.bf16.mxu1 %v2354_v14  ;;  %v1965_v18 = vld [vmem:[%s2914_s0] ss:$0 sm:$0xff]  ;;  %s2357_s5 = smov 120   ;;  %s2358_s6 = smov 112   ;;  %vm970_vm5 = vcmask 64512   ;;  %vm1217_vm6 = vcmask 1043456  }
 0x10f   : > { %2049 = vmatpush3.bf16.msra.mxu0 %v2224_v13  ;;  %2052 = vmatprep.mubr.msk.bf16.mxu0 %vm2355_vm3, %v2354_v14  ;;  %s2359_s4 = smov 96   ;;  %s2915_s2 = sld [smem:[#allocation20_spill]]  ;;  %vm1418_vm7 = vcmask 130048   ;;  %vm1420_vm8 = vcmask 195584  }
 0x110   : > { %2050 = vmatprep.subr.bf16.mxu0 %v2354_v14  ;;  %2070 = vmatprep.mubr.msk.bf16.mxu1 %vm2355_vm3, %v2354_v14  ;;  %s2916_s24 = sld [smem:[#allocation21_spill]]  ;;  %s2361_s28 = smov 8  }
 0x111   : > { %s2362_s3 = smov 16   ;;  %s2363_s18 = smov 24  }
 0x112   : > { %s2919_s1 = sld [smem:[#allocation28_spill]] }
 0x113   : > { %v2621_v16 = vld [vmem:[#allocation2] sm:$0xff]  ;;  %2051 = vmatpush3.bf16.msra.mxu0 %v2225_v15  ;;  %s2921_s22 = sld [smem:[#allocation29_spill]] }
 0x114   : > { %v870_v17 = vpack.c.bf16 %v2621_v16, %v2621_v16  ;;  %2056 = vmatprep.subr.bf16.mxu0 %v2354_v14  ;;  %s2928_s17 = sld [smem:[#allocation32_spill]] }
 0x115   : > { %v861_v47 = vld [vmem:[%s2915_s2] sm:$0xff] }
 0x116   : > { %2053 = vmatmul.mubr.msk.bf16.vlgmr.msra.gmra.mxu0 %vm894_vm4, %v870_v17  ;;  %s2917_s20 = scalar_lea.vmem %s2916_s24, %s2537_s25  ;;  %s2360_s25 = smov 64  }
 0x117   : > { %2058 = vmatprep.mubr.msk.bf16.mxu0 %vm2355_vm3, %v2354_v14  ;;  %v1964_v48 = vld [vmem:[%s2917_s20] ss:$0 sm:$0xff]  ;;  %s2924_s20 = sld [smem:[#allocation7_spill]] }
 0x118   : > { %v869_v49 = vadd.f32 %v1964_v48, %v861_v47  ;;  %s2920_s2 = scalar_lea.vmem %s2919_s1, %s2540_s26 }
 0x119   : > { %s2922_s24 = scalar_lea.vmem %s2921_s22, %s2540_s26 }
 0x1d6   : > { %v932_v19 = vpop.f32.mrf.mxu0 }
 0x1d7   : > { %v933_v20 = vadd.f32 %v1965_v18, %v932_v19 }
 0x1d8   : > { %v2054_v21 = vpop.f32.mrf.mxu0 }
 0x1d9   : > { %960 = vrot.lane.b32.xlu1 %v933_v20, %s2356_s30  ;;  %954 = vrot.lane.b32.xlu0 %v933_v20, %s2357_s5  ;;  %v2637_v23 = vpack.c.bf16 %v933_v20, %v933_v20  ;;  %v938_v25 = vmul.f32 0.35355338, %v933_v20 }
 0x1da   : > { %v935_v22 = vpop.f32.mrf.mxu0 }
 0x1db   : > { %v949_v34 = vpack.c.bf16 %v938_v25, %v938_v25 }
 0x1dc   : > { %v2055_v24 = vpop.f32.mrf.mxu0 }
 0x1dd   : > { %957 = vrot.lane.b32.xlu0 %v933_v20, %s2358_s6  ;;  %968 = vrot.lane.b32.xlu1 %v2637_v23, %s2359_s4 }
 0x1e1   : > { %940 = vrot.lane.b32.xlu1 %v938_v25, %s2357_s5  ;;  %s1746_s5 = sshll.u32 %s737_s13, 4  ;;  %s1747_s5 = int_to_ptr.vmem [resolvable:$true] %s1746_s5 }
 0x24b   : > { %v961_v26 = vpop.permute.xlu1 %960  ;;  %v955_v27 = vpop.permute.xlu0 %954 }
 0x24c   : > { %v2640_v28 = vpack.c.bf16 %v961_v26, %v961_v26  ;;  %v2642_v29 = vpack.c.bf16 %v955_v27, %v955_v27 }
 0x24e   : > { %1018 = vrot.lane.b32.xlu0 %v2642_v29, %s2359_s4  ;;  %1116 = vrot.lane.b32.xlu1 %v2640_v28, %s2359_s4 }
 0x24f   : > { %v958_v30 = vpop.permute.xlu0 %957  ;;  %v969_v31 = vpop.permute.xlu1 %968 }
 0x250   : > { %v2646_v32 = vpack.c.bf16 %v958_v30, %v958_v30  ;;  %v975_v33 = vsel %vm970_vm5, %v969_v31, 0 }
 0x251   : > { %2057 = vmatpush3.bf16.xpose.msra.mxu0 %v975_v33 }
 0x252   : > { %1067 = vrot.lane.b32.xlu0 %v2646_v32, %s2359_s4  ;;  %946 = vrot.lane.b32.xlu1 %v938_v25, %s2356_s30  ;;  %s2918_s30 = scalar_lea.vmem %s2847_s9, %s2540_s26  ;;  %s2258_s26 = scalar_lea.vmem %s1747_s5, 128 }
 0x253   : > { %2062 = vmatprep.subr.bf16.mxu0 %v2354_v14  ;;  %v941_v37 = vpop.permute.xlu1 %940  ;;  %p2259_p1 = scmp.ne.s32.totalorder %s1747_s5, %s2258_s26 }
 0x254   : > { %v950_v41 = vpack.c.bf16 %v941_v37, %v941_v37 }
 0x255   : > { %p2260_p2 = pnand %p2259_p1, %p2509_p3 }
 0x256   : > { %943 = vrot.lane.b32.xlu0 %v938_v25, %s2358_s6 }
 0x257   : > { %p2261_p4 = pneg %p2260_p2 }
 0x258   : > { %2059 = vmatmul.mubr.msk.bf16.vlgmr.msra.gmra.mxu0 %vm970_vm5, %v949_v34 }
 0x259   : > { %2064 = vmatprep.mubr.msk.bf16.mxu0 %vm2355_vm3, %v2354_v14 }
 0x2c0   : > { %v1019_v35 = vpop.permute.xlu0 %1018  ;;  %v1117_v40 = vpop.permute.xlu1 %1116 }
 0x2c1   : > { %v1024_v36 = vsel %vm970_vm5, %v1019_v35, 0  ;;  %v1122_v43 = vsel %vm970_vm5, %v1117_v40, 0 }
 0x2c2   : > { %2063 = vmatpush3.bf16.xpose.msra.mxu0 %v1024_v36 }
 0x2c3   : > { %2074 = vmatprep.subr.bf16.mxu0 %v2354_v14 }
 0x2c4   : > { %v1068_v38 = vpop.permute.xlu0 %1067  ;;  %v947_v45 = vpop.permute.xlu1 %946 }
 0x2c5   : > { %v1073_v39 = vsel %vm970_vm5, %v1068_v38, 0  ;;  %v952_v46 = vpack.c.bf16 %v947_v45, %v947_v45 }
 0x2c6   : > { %2069 = vmatpush3.bf16.xpose.msra.mxu1 %v1073_v39 }
 0x2c7   : > { %2080 = vmatprep.subr.bf16.mxu1 %v2354_v14 }
 0x2c8   : > { %v944_v42 = vpop.permute.xlu0 %943 }
 0x2c9   : > { %2065 = vmatmul.mubr.msk.bf16.vlgmr.msra.gmra.mxu0 %vm970_vm5, %v950_v41  ;;  %v951_v44 = vpack.c.bf16 %v944_v42, %v944_v42 }
 0x2ca   : > { %2075 = vmatpush3.bf16.xpose.msra.mxu0 %v1122_v43  ;;  %2076 = vmatprep.mubr.msk.bf16.mxu0 %vm2355_vm3, %v2354_v14 }
 0x2cb   : > { %2086 = vmatprep.subr.bf16.mxu0 %v2354_v14 }
 0x2cd   : > { %2071 = vmatmul.mubr.msk.bf16.vlgmr.msra.gmra.mxu1 %vm970_vm5, %v951_v44 }
 0x2ce   : > { %2082 = vmatprep.mubr.msk.bf16.mxu1 %vm2355_vm3, %v2354_v14 }
 0x2d1   : > { %2077 = vmatmul.mubr.msk.bf16.vlgmr.msra.gmra.mxu0 %vm970_vm5, %v952_v46 }
 0x2d2   : > { %2088 = vmatprep.mubr.msk.bf16.mxu0 %vm2355_vm3, %v2354_v14 }
 0x318   : > { %v1011_v50 = vpop.f32.mrf.mxu0 }
 0x319   : > { %v1012_v51 = vadd.f32 %v1011_v50, %v869_v49 }
 0x31a   : > { %v2060_v52 = vpop.f32.mrf.mxu0 }
 0x31b   : > { %v1164_v53 = vsel %vm970_vm5, %v1012_v51, -inf }
 0x31c   : > { %1165 = vmax.xlane.f32.xlu0 %v1164_v53  ;;  %v1014_v54 = vpop.f32.mrf.mxu0 }
 0x31e   : > { %v2061_v55 = vpop.f32.mrf.mxu0 }
 0x389   : > { %v1060_v56 = vpop.f32.mrf.mxu0 }
 0x38a   : > { %v1061_v57 = vadd.f32 %v1060_v56, %v869_v49 }
 0x38b   : > { %v2066_v58 = vpop.f32.mrf.mxu0 }
 0x38c   : > { %v1167_v59 = vsel %vm970_vm5, %v1061_v57, -inf }
 0x38d   : > { %v1109_v60 = vpop.f32.mrf.mxu1  ;;  %1168 = vmax.xlane.f32.xlu1 %v1167_v59  ;;  %v1063_v61 = vpop.f32.mrf.mxu0 }
 0x38e   : > { %v1110_v62 = vadd.f32 %v1109_v60, %v869_v49  ;;  %v2226_v60 = vld [vmem:[%s2563_s23 + $0x8] sm:$0xff]   ;;  %v2227_v61 = vld [vmem:[%s2563_s23] sm:$0xff]  }
 0x38f   : > { %v2067_v63 = vpop.f32.mrf.mxu0  ;;  %v2072_v0 = vpop.f32.mrf.mxu1 }
 0x390   : > { %v1170_v1 = vsel %vm970_vm5, %v1110_v62, -inf }
 0x391   : > { %v1112_v2 = vpop.f32.mrf.mxu1  ;;  %1171 = vmax.xlane.f32.xlu0 %v1170_v1  ;;  %v1158_v3 = vpop.f32.mrf.mxu0 }
 0x392   : > { %v1159_v4 = vadd.f32 %v1158_v3, %v869_v49 }
 0x393   : > { %v2073_v5 = vpop.f32.mrf.mxu1  ;;  %v2078_v6 = vpop.f32.mrf.mxu0 }
 0x394   : > { %v1173_v7 = vsel %vm970_vm5, %v1159_v4, -inf }
 0x395   : > { %1174 = vmax.xlane.f32.xlu0 %v1173_v7  ;;  %v1161_v8 = vpop.f32.mrf.mxu0 }
 0x397   : > { %v2079_v9 = vpop.f32.mrf.mxu0 }
 0x39e   : > { %1212 = vrot.lane.b32.xlu1 %v2637_v23, %s2360_s25 }
 0x3a5   : > { %v1166_v10 = vpop.xlane.xlu0 %1165 }
 0x3a6   : > { %v1176_v11 = vsub.f32 %v1012_v51, %v1166_v10 }
 0x3a8   : > { %v1180_v12 = vmul.f32 1.442695, %v1176_v11 }
 0x3aa   : > { %2238 = vpow2.f32 %v1180_v12 }
 0x3b7   : > { %v2239_v13 = vpop.eup %2238 }
 0x3b8   : > { %v1188_v15 = vsel %vm970_vm5, %v2239_v13, 0.0 }
 0x3c2   : > { %1189 = vadd.xlane.f32.xlu1 %v1188_v15 }
 0x416   : > { %v1169_v17 = vpop.xlane.xlu1 %1168 }
 0x417   : > { %v1177_v18 = vsub.f32 %v1061_v57, %v1169_v17 }
 0x419   : > { %v1182_v19 = vmul.f32 1.442695, %v1177_v18 }
 0x41a   : > { %v1172_v20 = vpop.xlane.xlu0 %1171  ;;  %v1213_v21 = vpop.permute.xlu1 %1212 }
 0x41b   : > { %2240 = vpow2.f32 %v1182_v19  ;;  %v1178_v22 = vsub.f32 %v1110_v62, %v1172_v20  ;;  %v1219_v24 = vsel %vm1217_vm6, %v1213_v21, 0  ;;  %v1977_v19 = vld [vmem:[%s2918_s30] ss:$0 sm:$0xff] }
 0x41c   : > { %2081 = vmatpush3.bf16.msra.mxu1 %v1219_v24 }
 0x41d   : > { %v1184_v23 = vmul.f32 1.442695, %v1178_v22  ;;  %2092 = vmatprep.subr.bf16.mxu1 %v2354_v14 }
 0x41e   : > { %v1175_v25 = vpop.xlane.xlu0 %1174 }
 0x41f   : > { %2242 = vpow2.f32 %v1184_v23  ;;  %v1179_v26 = vsub.f32 %v1159_v4, %v1175_v25 }
 0x421   : > { %v1186_v27 = vmul.f32 1.442695, %v1179_v26 }
 0x423   : > { %2244 = vpow2.f32 %v1186_v27 }
 0x428   : > { %v2241_v30 = vpop.eup %2240 }
 0x429   : > { %v1191_v31 = vsel %vm970_vm5, %v2241_v30, 0.0 }
 0x42a   : > { %1192 = vadd.xlane.f32.xlu0 %v1191_v31 }
 0x42c   : > { %v2243_v33 = vpop.eup %2242 }
 0x42d   : > { %v1194_v34 = vsel %vm970_vm5, %v2243_v33, 0.0 }
 0x42e   : > { %1195 = vadd.xlane.f32.xlu1 %v1194_v34 }
 0x430   : > { %v2245_v35 = vpop.eup %2244 }
 0x431   : > { %v1197_v36 = vsel %vm970_vm5, %v2245_v35, 0.0 }
 0x432   : > { %1198 = vadd.xlane.f32.xlu0 %v1197_v36  ;;  %v2230_v36 = vld [vmem:[%s2586_s8 + $0x38] sm:$0xff]  }
 0x43f   : > { %1309 = vrot.lane.b32.xlu1 %v2646_v32, %s2360_s25 }
 0x443   : > { %1357 = vrot.lane.b32.xlu1 %v2640_v28, %s2360_s25 }
 0x448   : > { %1261 = vrot.lane.b32.xlu0 %v2642_v29, %s2360_s25 }
 0x44b   : > { %v1190_v37 = vpop.xlane.xlu1 %1189 }
 0x44c   : > { %2246 = vrcp.f32 %v1190_v37  ;;  %v2231_v37 = vld [vmem:[%s2586_s8 + $0x30] sm:$0xff]  }
 0x459   : > { %v2247_v38 = vpop.eup %2246 }
 0x45a   : > { %v1204_v39 = vmul.f32 %v2247_v38, %v2239_v13  ;;  %v2232_v38 = vld [vmem:[%s2586_s8 + $0x28] sm:$0xff]  }
 0x45c   : > { %v1208_v40 = vpack.c.bf16 %v1204_v39, %v1204_v39  ;;  %v2233_v39 = vld [vmem:[%s2586_s8 + $0x20] sm:$0xff]  }
 0x45e   : > { %2083 = vmatmul.mubr.msk.bf16.vlgmr.msra.gmra.mxu1 %vm970_vm5, %v1208_v40  ;;  %v2234_v40 = vld [vmem:[%s2586_s8 + $0x18] sm:$0xff]  }
 0x45f   : > { %2094 = vmatprep.mubr.msk.bf16.mxu1 %vm2355_vm3, %v2354_v14 }
 0x4b3   : > { %v1193_v41 = vpop.xlane.xlu0 %1192 }
 0x4b4   : > { %2248 = vrcp.f32 %v1193_v41  ;;  %v2235_v41 = vld [vmem:[%s2586_s8 + $0x10] sm:$0xff]  }
 0x4b7   : > { %v1196_v42 = vpop.xlane.xlu1 %1195 }
 0x4b8   : > { %2250 = vrcp.f32 %v1196_v42 }
 0x4bb   : > { %v1310_v32 = vpop.permute.xlu1 %1309  ;;  %v1199_v43 = vpop.xlane.xlu0 %1198 }
 0x4bc   : > { %v1315_v28 = vsel %vm1217_vm6, %v1310_v32, 0  ;;  %2252 = vrcp.f32 %v1199_v43 }
 0x4bd   : > { %2093 = vmatpush3.bf16.msra.mxu1 %v1315_v28 }
 0x4be   : > { %2104 = vmatprep.subr.bf16.mxu1 %v2354_v14 }
 0x4bf   : > { %v1262_v29 = vpop.permute.xlu0 %1261  ;;  %v1358_v47 = vpop.permute.xlu1 %1357 }
 0x4c0   : > { %v1267_v44 = vsel %vm1217_vm6, %v1262_v29, 0  ;;  %v1363_v50 = vsel %vm1217_vm6, %v1358_v47, 0  ;;  %v1981_v29 = vld [vmem:[%s779_s29] ss:$0 sm:$0xff] }
 0x4c1   : > { %v2249_v45 = vpop.eup %2248  ;;  %2087 = vmatpush3.bf16.msra.mxu0 %v1267_v44 }
 0x4c2   : > { %2098 = vmatprep.subr.bf16.mxu0 %v2354_v14  ;;  %v1205_v46 = vmul.f32 %v2249_v45, %v2241_v30  ;;  %v1982_v45 = vld [vmem:[%s782_s27] ss:$0 sm:$0xff] }
 0x4c4   : > { %v1209_v48 = vpack.c.bf16 %v1205_v46, %v1205_v46 }
 0x4c5   : > { %v2251_v49 = vpop.eup %2250 }
 0x4c6   : > { %2089 = vmatmul.mubr.msk.bf16.vlgmr.msra.gmra.mxu0 %vm970_vm5, %v1209_v48  ;;  %v1206_v51 = vmul.f32 %v2251_v49, %v2243_v33  ;;  %v2236_v49 = vld [vmem:[%s2586_s8 + $0x8] sm:$0xff]  }
 0x4c7   : > { %2099 = vmatpush3.bf16.msra.mxu0 %v1363_v50  ;;  %2100 = vmatprep.mubr.msk.bf16.mxu0 %vm2355_vm3, %v2354_v14  ;;  %v2237_v50 = vld [vmem:[%s2586_s8] sm:$0xff]   ;;  %s2923_s8 = sld [smem:[#allocation10_spill]] }
 0x4c8   : > { %v1210_v52 = vpack.c.bf16 %v1206_v51, %v1206_v51  ;;  %2112 = vmatprep.subr.bf16.mxu0 %v2354_v14  ;;  %v1983_v51 = vld [vmem:[%s2920_s2] ss:$0 sm:$0xff] }
 0x4c9   : > { %v2253_v53 = vpop.eup %2252 }
 0x4ca   : > { %2095 = vmatmul.mubr.msk.bf16.vlgmr.msra.gmra.mxu1 %vm970_vm5, %v1210_v52  ;;  %v1207_v54 = vmul.f32 %v2253_v53, %v2245_v35  ;;  %v2228_v35 = vld [vmem:[%s2572_s21 + $0x8] sm:$0xff]  }
 0x4cb   : > { %2108 = vmatprep.mubr.msk.bf16.mxu1 %vm2355_vm3, %v2354_v14  ;;  %2105 = vmatpush3.bf16.msra.mxu1 %v2226_v60 }
 0x4cc   : > { %v1211_v55 = vpack.c.bf16 %v1207_v54, %v1207_v54  ;;  %2106 = vmatprep.subr.bf16.mxu1 %v2354_v14 }
 0x4ce   : > { %2101 = vmatmul.mubr.msk.bf16.vlgmr.msra.gmra.mxu0 %vm970_vm5, %v1211_v55 }
 0x4cf   : > { %2116 = vmatprep.mubr.msk.bf16.mxu0 %vm2355_vm3, %v2354_v14  ;;  %2107 = vmatpush3.bf16.msra.mxu1 %v2227_v61 }
 0x4d0   : > { %2120 = vmatprep.subr.bf16.mxu1 %v2354_v14  ;;  %2113 = vmatpush3.bf16.msra.mxu0 %v2228_v35 }
 0x4d1   : > { %2114 = vmatprep.subr.bf16.mxu0 %v2354_v14 }
 0x51e   : > { %v1255_v56 = vpop.f32.mrf.mxu1 }
 0x520   : > { %v2084_v57 = vpop.f32.mrf.mxu1 }
 0x522   : > { %v1258_v58 = vpop.f32.mrf.mxu1 }
 0x524   : > { %v2085_v59 = vpop.f32.mrf.mxu1 }
 0x586   : > { %v1303_v62 = vpop.f32.mrf.mxu0 }
 0x587   : > { %1406 = vrot.lane.b32.xlu0 %v1303_v62, %s2361_s28 }
 0x588   : > { %v2090_v63 = vpop.f32.mrf.mxu0 }
 0x58a   : > { %v1306_v0 = vpop.f32.mrf.mxu0  ;;  %v1351_v1 = vpop.f32.mrf.mxu1 }
 0x58b   : > { %1410 = vrot.lane.b32.xlu1 %v1351_v1, %s2362_s3 }
 0x58c   : > { %v2091_v2 = vpop.f32.mrf.mxu0  ;;  %v2096_v3 = vpop.f32.mrf.mxu1 }
 0x58e   : > { %v1354_v4 = vpop.f32.mrf.mxu1  ;;  %v1399_v5 = vpop.f32.mrf.mxu0 }
 0x58f   : > { %1414 = vrot.lane.b32.xlu0 %v1399_v5, %s2363_s18 }
 0x590   : > { %v2097_v6 = vpop.f32.mrf.mxu1  ;;  %v2102_v7 = vpop.f32.mrf.mxu0 }
 0x592   : > { %v1402_v8 = vpop.f32.mrf.mxu0 }
 0x594   : > { %v2103_v9 = vpop.f32.mrf.mxu0 }
 0x5f9   : > { %v1407_v10 = vpop.permute.xlu0 %1406 }
 0x5fa   : > { %v1417_v12 = vsel %vm970_vm5, %v1255_v56, %v1407_v10 }
 0x5fd   : > { %v1411_v11 = vpop.permute.xlu1 %1410 }
 0x5fe   : > { %v1419_v13 = vsel %vm1418_vm7, %v1417_v12, %v1411_v11  ;;  %v1996_v11 = vld [vmem:[%s785_s10] ss:$0 sm:$0xff]  ;;  %s2929_s10 = sand.u32 1, %s2924_s20  }
 0x5ff   : > { %s1733_s1 = scalar_lea.sflag [#allocation4], %s2929_s10 }
 0x601   : > { %v1415_v15 = vpop.permute.xlu0 %1414 }
 0x602   : > { %v1421_v17 = vsel %vm1420_vm8, %v1419_v13, %v1415_v15  ;;  %v1997_v13 = vld [vmem:[%s788_s16] ss:$0 sm:$0xff]  ;;  %s2364_s16 = smov [#allocation3]  }
 0x603   : > { %v1422_v18 = vpack.c.bf16 %v1421_v17, %v1421_v17  ;;  %s2262_s2 = sshll.u32 %s2364_s16, 4  ;;  %s2263_s2 = int_to_ptr.vmem [resolvable:$false] %s2262_s2 }
 0x604   : > { %s2264_s27 = scalar_lea.vmem %s2263_s2, 256  ;;  %p2265_p5 = scmp.lt.s32.totalorder %s1747_s5, %s2263_s2 }
 0x605   : > { %2109 = vmatmul.mubr.msk.bf16.vlgmr.msra.gmra.mxu1 %vm894_vm4, %v1422_v18  ;;  %p2266_p6 = scmp.lt.s32.totalorder %s2264_s27, %s2258_s26 }
 0x606   : > { %2136 = vmatprep.mubr.msk.bf16.mxu1 %vm2355_vm3, %v2354_v14  ;;  %2121 = vmatpush3.bf16.msra.mxu1 %v2230_v36 }
 0x607   : > { %2122 = vmatprep.subr.bf16.mxu1 %v2354_v14  ;;  %p2267_p7 = por %p2266_p6, %p2265_p5 }
 0x609   : > { %p2268_p8 = pnand %p2267_p7, %p2261_p4 }
 0x60a   : > { %2123 = vmatpush3.bf16.msra.mxu1 %v2231_v37 }
 0x60b   : > { %2124 = vmatprep.subr.bf16.mxu1 %v2354_v14 }
 0x60e   : > { %2125 = vmatpush3.bf16.msra.mxu1 %v2232_v38 }
 0x60f   : > { %2126 = vmatprep.subr.bf16.mxu1 %v2354_v14 }
 0x612   : > { %2127 = vmatpush3.bf16.msra.mxu1 %v2233_v39 }
 0x613   : > { %2128 = vmatprep.subr.bf16.mxu1 %v2354_v14 }
 0x616   : > { %2129 = vmatpush3.bf16.msra.mxu1 %v2234_v40 }
 0x617   : > { %2130 = vmatprep.subr.bf16.mxu1 %v2354_v14 }
 0x61a   : > { %2131 = vmatpush3.bf16.msra.mxu1 %v2235_v41 }
 0x61b   : > { %2132 = vmatprep.subr.bf16.mxu1 %v2354_v14 }
 0x61e   : > { %2133 = vmatpush3.bf16.msra.mxu1 %v2236_v49 }
 0x61f   : > { %2134 = vmatprep.subr.bf16.mxu1 %v2354_v14  ;;  %v1987_v14 = vld [vmem:[%s2922_s24] ss:$0 sm:$0xff] }
 0x622   : > { %2135 = vmatpush3.bf16.msra.mxu1 %v2237_v50 }
 0x6c5   : > { %v1483_v20 = vpop.f32.mrf.mxu1 }
 0x6c6   : > { %v1484_v21 = vadd.f32 %v1977_v19, %v1483_v20 }
 0x6c7   : > { %v2110_v22 = vpop.f32.mrf.mxu1 }
 0x6c8   : > { %v1489_v24 = vadd.f32 %v1484_v21, %v2621_v16  ;;  %v2229_v16 = vld [vmem:[%s2572_s21] sm:$0xff]   ;;  %s1999_s21 = sshll.u32 %s2923_s8, 7 }
 0x6c9   : > { %v1486_v23 = vpop.f32.mrf.mxu1  ;;  %2115 = vmatpush3.bf16.msra.mxu0 %v2229_v16  ;;  %s2786_s29 = scalar_lea.hbm %s2928_s17, %s1999_s21 }
 0x6ca   : > { %v1492_v25 = vsel %vm894_vm4, %v1489_v24, 0.0 }
 0x6cb   : > { %1493 = vadd.xlane.f32.xlu1 %v1492_v25  ;;  %v2111_v26 = vpop.f32.mrf.mxu1 }
 0x754   : > { %v1494_v27 = vpop.xlane.xlu1 %1493 }
 0x755   : > { %v1496_v30 = vmul.f32 0.03125, %v1494_v27 }
 0x757   : > { %v1497_v31 = vsub.f32 %v1489_v24, %v1496_v30 }
 0x759   : > { %v1498_v33 = vmul.f32 %v1497_v31, %v1497_v31 }
 0x75b   : > { %v1499_v34 = vsel %vm894_vm4, %v1498_v33, 0.0 }
 0x75c   : > { %1500 = vadd.xlane.f32.xlu0 %v1499_v34 }
 0x7e5   : > { %v1501_v42 = vpop.xlane.xlu0 %1500 }
 0x7e6   : > { %v1502_v32 = vmul.f32 0.03125, %v1501_v42 }
 0x7e8   : > { %v1503_v43 = vadd.f32 1e-05, %v1502_v32 }
 0x7ea   : > { %2254 = vrsqrt.f32 %v1503_v43 }
 0x7f7   : > { %v2255_v28 = vpop.eup %2254 }
 0x7f8   : > { %v1505_v44 = vmul.f32 %v2255_v28, %v1497_v31 }
 0x7fa   : > { %v1512_v46 = vmul.f32 %v1981_v29, %v1505_v44 }
 0x7fc   : > { %v1519_v47 = vadd.f32 %v1982_v45, %v1512_v46 }
 0x7fe   : > { %v1520_v48 = vpack.c.bf16 %v1519_v47, %v1519_v47 }
 0x800   : > { %2117 = vmatmul.mubr.msk.bf16.vlgmr.msra.gmra.mxu0 %vm894_vm4, %v1520_v48 }
 0x8c0   : > { %v1581_v52 = vpop.f32.mrf.mxu0 }
 0x8c1   : > { %v1582_v53 = vadd.f32 %v1983_v51, %v1581_v52 }
 0x8c2   : > { %v2118_v54 = vpop.f32.mrf.mxu0 }
 0x8c3   : > { %v1587_v55 = vmax.f32 %v1582_v53, 0.0 }
 0x8c4   : > { %v1584_v56 = vpop.f32.mrf.mxu0 }
 0x8c5   : > { %v1588_v57 = vpack.c.bf16 %v1587_v55, %v1587_v55 }
 0x8c6   : > { %v2119_v58 = vpop.f32.mrf.mxu0 }
 0x8c7   : > { %2137 = vmatmul.mubr.bf16.vlgmr.msra.gmra.mxu1 %v1588_v57 }
 0x987   : > { %v1694_v59 = vpop.f32.mrf.mxu1 }
 0x988   : > { %v1695_v60 = vadd.f32 %v1987_v14, %v1694_v59 }
 0x989   : > { %v2138_v61 = vpop.f32.mrf.mxu1 }
 0x98a   : > { %v1700_v62 = vadd.f32 %v1695_v60, %v1519_v47 }
 0x98b   : > { %v1697_v63 = vpop.f32.mrf.mxu1 }
 0x98c   : > { %v1703_v0 = vsel %vm894_vm4, %v1700_v62, 0.0 }
 0x98d   : > { %1704 = vadd.xlane.f32.xlu0 %v1703_v0  ;;  %v2139_v1 = vpop.f32.mrf.mxu1 }
 0xa16   : > { %v1705_v2 = vpop.xlane.xlu0 %1704 }
 0xa17   : > { %v1706_v3 = vmul.f32 0.03125, %v1705_v2 }
 0xa19   : > { %v1707_v4 = vsub.f32 %v1700_v62, %v1706_v3 }
 0xa1b   : > { %v1708_v5 = vmul.f32 %v1707_v4, %v1707_v4 }
 0xa1d   : > { %v1709_v6 = vsel %vm894_vm4, %v1708_v5, 0.0 }
 0xa1e   : > { %1710 = vadd.xlane.f32.xlu1 %v1709_v6 }
 0xaa7   : > { %v1711_v7 = vpop.xlane.xlu1 %1710 }
 0xaa8   : > { %v1712_v8 = vmul.f32 0.03125, %v1711_v7 }
 0xaaa   : > { %v1713_v9 = vadd.f32 1e-05, %v1712_v8 }
 0xaac   : > { %2256 = vrsqrt.f32 %v1713_v9 }
 0xab9   : > { %v2257_v10 = vpop.eup %2256 }
 0xaba   : > { %v1715_v12 = vmul.f32 %v2257_v10, %v1707_v4 }
 0xabc   : > { %v1722_v15 = vmul.f32 %v1996_v11, %v1715_v12 }
 0xabe   : > { %v1729_v17 = vadd.f32 %v1997_v13, %v1722_v15 }
 0xac0   : > { %1730 = vst.msk [vmem:[#allocation2] sm:$0xff] %vm894_vm4, %v1729_v17  ;;  %1731 = vst.msk [vmem:[%s737_s13] sm:$0xff] %vm894_vm4, %v1729_v17 }
 0xac1   : > { %2271 = shalt.err (!%p2268_p8)
}
 0xac2   : > { %s2272_s13 = scalar_lea.hbm %s2786_s29, 128  ;;  %s2276_s22 = scalar_lea.hbm %s2928_s17, 256 }
 0xac3   : > { %p2273_p10 = scmp.ne.s32.totalorder %s2786_s29, %s2272_s13  ;;  %p2277_p13 = scmp.lt.s32.totalorder %s2786_s29, %s2928_s17 }
 0xac4   : > { %p2278_p0 = scmp.lt.s32.totalorder %s2276_s22, %s2272_s13 }
 0xac5   : > { %p2274_p11 = pnand %p2273_p10, %p2509_p3 }
 0xac6   : > { %p2279_p1 = por %p2278_p0, %p2277_p13 }
 0xac7   : > { %p2275_p12 = pneg %p2274_p11 }
 0xac9   : > { %p2280_p2 = pnand %p2279_p1, %p2275_p12 }
 0xacb   : > { %2283 = shalt.err (!%p2280_p2)
}
 0xacc   : > { %2140 = dma.vmem_to_hbm [thread:$0]  (%p2509_p3), %s1747_s5, 128, %s2786_s29, %s1733_s1  }
 0xacd PF: > { %s2930_s20 = sld [smem:[#allocation13_spill]] }
 0xace   : > { %s2931_s28 = sld [smem:[#allocation6_spill]] }
 0xad3   : > { %p2146_p4 = scmp.ge.s32.totalorder %s2930_s20, 2 }
 0xad4   : > { %s1758_s18 = sand.u32 1, %s2931_s28  }
 0xad5   : > { %p2143_p5 = pnand %p2146_p4, %p2519_p9  ;;  %s1759_s23 = scalar_lea.sflag [#allocation4], %s1758_s18 }
 0xad7   : > { %p2144_p6 = pneg %p2143_p5 }
 0xad9   : > { %2317 = dma.done.wait (%p2144_p6), %s1759_s23, 128  }
 0xada   : > { %2319 = vsyncadd (%p2144_p6), %s1759_s23, 4294967168  ;;  %s31_s20 = sadd.s32 1, %s2930_s20   ;;  %s2933_s27 = sld [smem:[#allocation7_spill]] }
 0xadb   : > { %p28_p7 = scmp.ge.s32.totalorder %s31_s20, 6   ;;  %s2934_s28 = sld [smem:[#allocation8_spill]] }
 0xadc   : > { %s2935_s29 = sld [smem:[#allocation18_spill]] }
 0xadd   : > { %s2936_s30 = sld [smem:[#allocation11_spill]]  ;;  %30 = sbr.rel (!%p28_p7) target bundleno = 20 (0x14), region = 170 }
 0xade   : > { %s2937_s0 = sld [smem:[#allocation12_spill]] }
 0xadf   : > { %s2938_s19 = sld [smem:[#allocation14_spill]] }
 0xae0   : > { %s2939_s1 = sld [smem:[#allocation16_spill]] }
 0xae2   :  { %1764 = vsyncpa [#allocation4], 1 }
 0xae3   :  { %1766 = vsyncpa [#allocation4 + $0x1], 1 }

</bundles_post_ra>
